<compile_context>
chip_gen: v5e
topology: v5e:2x2
jax: 0.10.0
libtpu: 0.0.40
codegen_flags: <defaults>
</compile_context>

<pallas_src>
import functools

import jax
import jax.numpy as jnp
from jax import lax
from jax.experimental import pallas as pl
from jax.experimental.pallas import tpu as pltpu


def _layer_norm(x, gamma, beta, eps=1e-5):
    # x: (T, H), gamma/beta: (1, H). PyTorch LayerNorm: biased variance, eps=1e-5.
    mean = jnp.mean(x, axis=-1, keepdims=True)
    var = jnp.mean((x - mean) ** 2, axis=-1, keepdims=True)
    return (x - mean) * lax.rsqrt(var + eps) * gamma + beta


# --------------- Pass 1: Q/K/V projections (computed once per row) -----------
def qkv_proj_kernel(src_ref, wq_ref, bq_ref, wk_ref, bk_ref, wv_ref, bv_ref,
                    q_ref, k_ref, v_ref, *, q_scale):
    x = src_ref[0].astype(jnp.bfloat16)                       # (ts, H)
    q = jnp.dot(x, wq_ref[...], preferred_element_type=jnp.float32) + bq_ref[...]
    k = jnp.dot(x, wk_ref[...], preferred_element_type=jnp.float32) + bk_ref[...]
    v = jnp.dot(x, wv_ref[...], preferred_element_type=jnp.float32) + bv_ref[...]
    q_ref[0] = (q * q_scale).astype(jnp.bfloat16)             # pre-scaled queries
    k_ref[0] = k.astype(jnp.bfloat16)
    v_ref[0] = v.astype(jnp.bfloat16)


# --------------- Pass 2: attention + residual + LayerNorm1 -------------------
def attn_kernel(src_ref, q_ref, k_ref, v_ref, bias_ref,
                wo_ref, bo_ref, ln1_g_ref, ln1_b_ref, out_ref,
                *, n_heads, head_dim, exp_dtype):
    x = src_ref[0]                                            # (tq, H) f32 residual
    q = q_ref[0]                                              # (tq, H) bf16 (scaled)
    k = k_ref[0]                                              # (S,  H) bf16
    v = v_ref[0]                                              # (S,  H) bf16
    bias = bias_ref[0]                                        # (1,  S) f32

    attn_out = jnp.zeros_like(x)                              # (tq, H) f32
    # TODO(synk): flash-style KV-block inner loop (online softmax) for long S,
    # and a head-major (n_heads, ., head_dim) layout / head fusion to avoid
    # lane-misaligned slices + MXU under-fill when head_dim < 128.
    for h in range(n_heads):
        lo = h * head_dim
        hi = lo + head_dim
        qh = q[:, lo:hi]                                      # (tq, d)
        kh = k[:, lo:hi]                                      # (S,  d)
        vh = v[:, lo:hi]                                      # (S,  d)
        scores = lax.dot_general(
            qh, kh, (((1,), (1,)), ((), ())),
            preferred_element_type=jnp.float32) + bias        # (tq, S) f32
        s_max = jnp.max(scores, axis=-1, keepdims=True)
        p = jnp.exp((scores - s_max).astype(exp_dtype))       # bf16 EUP on v6e/v7x
        denom = jnp.sum(p.astype(jnp.float32), axis=-1, keepdims=True)
        ctx = jnp.dot(p.astype(jnp.bfloat16), vh,
                      preferred_element_type=jnp.float32)     # (tq, d) un-normalized
        ctx = ctx * pl.reciprocal(denom, approx=True)         # normalize after PV
        # fold head context straight into the output projection (no concat)
        attn_out = attn_out + jnp.dot(ctx.astype(jnp.bfloat16), wo_ref[lo:hi, :],
                                      preferred_element_type=jnp.float32)
    attn_out = attn_out + bo_ref[...]
    out_ref[0] = _layer_norm(x + attn_out, ln1_g_ref[...], ln1_b_ref[...])


# --------------- Pass 3: FFN (streamed P tiles) + residual + LayerNorm2 ------
def ffn_kernel(src1_ref, w1_ref, b1_ref, w2_ref, b2_ref, ln2_g_ref, ln2_b_ref,
               out_ref, acc_ref):
    p_idx = pl.program_id(2)

    @pl.when(p_idx == 0)
    def _():
        acc_ref[...] = jnp.zeros_like(acc_ref)

    x = src1_ref[0]                                           # (ts, H) f32
    h1 = jnp.dot(x.astype(jnp.bfloat16), w1_ref[...],
                 preferred_element_type=jnp.float32) + b1_ref[...]
    h1 = jnp.maximum(h1, 0.0)
    acc_ref[...] += jnp.dot(h1.astype(jnp.bfloat16), w2_ref[...],
                            preferred_element_type=jnp.float32)

    @pl.when(p_idx == pl.num_programs(2) - 1)
    def _():
        ff = acc_ref[...] + b2_ref[...]
        out_ref[0] = _layer_norm(x + ff, ln2_g_ref[...], ln2_b_ref[...])


# ------------------------------- wrapper --------------------------------------
def _pick_block(dim, target, quantum):
    """Largest divisor of `dim` <= target that is a multiple of `quantum`
    (keeps BlockSpecs (8,128)-legal); falls back to the full extent."""
    if dim <= target:
        return dim
    for cand in range(target, 0, -1):
        if dim % cand == 0 and cand % quantum == 0:
            return cand
    # TODO(synk): pad + mask awkward extents instead of falling back to full.
    return dim


def _tpu_vmem_capacity_bytes():
    try:
        return int(pltpu.get_tpu_info().vmem_capacity_bytes)
    except Exception:
        kind = jax.devices()[0].device_kind.lower()
        return (64 if "v7" in kind else 128) * 1024 * 1024


def encoder_layer(src, src_mask, params, n_heads):
    B, S, H = src.shape
    P = params["w1"].shape[1]
    head_dim = H // n_heads

    # generation-aware VMEM / tile sizing (v7x has 64 MiB VMEM, v5e/v6e 128 MiB)
    vmem_cap = _tpu_vmem_capacity_bytes()
    vmem_limit = int(min(100 * 1024 * 1024, (vmem_cap * 3) // 4))
    tq_target = 128 if vmem_cap <= 64 * 1024 * 1024 else 256

    tq = _pick_block(S, tq_target, 8)        # sequence-row tile
    pb = _pick_block(P, 512, 128)            # FFN hidden (pf_dim) tile
    n_q = S // tq
    n_p = P // pb

    # bf16 exp uses the EUP bf16 path on v6e/v7x (~2x); v5e has no bf16 EUP.
    kind = jax.devices()[0].device_kind.lower()
    exp_dtype = jnp.bfloat16 if ("v6" in kind or "v7" in kind) else jnp.float32

    # additive mask bias: [B,1,1,S] {0,1} -> [B,1,S] f32 {-1e10, 0}
    bias = (src_mask.reshape(B, 1, S).astype(jnp.float32) - 1.0) * 1e10

    bf16 = lambda w: w.astype(jnp.bfloat16)

    cparams2 = pltpu.CompilerParams(
        dimension_semantics=("parallel", "parallel"),
        vmem_limit_bytes=vmem_limit)

    full2 = lambda shape: pl.BlockSpec(shape, lambda b, i: (0,) * len(shape))
    row2 = pl.BlockSpec((1, tq, H), lambda b, i: (b, i, 0))

    # ---- pass 1: Q/K/V projections (once per row, bf16 outputs) ----
    q, k, v = pl.pallas_call(
        functools.partial(qkv_proj_kernel, q_scale=float(head_dim) ** -0.5),
        out_shape=(jax.ShapeDtypeStruct((B, S, H), jnp.bfloat16),) * 3,
        grid_spec=pltpu.PrefetchScalarGridSpec(
            num_scalar_prefetch=0,
            grid=(B, n_q),
            in_specs=[
                row2,                                           # src rows
                full2((H, H)), full2((1, H)),                   # wq, bq
                full2((H, H)), full2((1, H)),                   # wk, bk
                full2((H, H)), full2((1, H)),                   # wv, bv
            ],
            out_specs=[row2, row2, row2],
        ),
        compiler_params=cparams2,
    )(src, bf16(params["wq"]), params["bq"], bf16(params["wk"]), params["bk"],
      bf16(params["wv"]), params["bv"])

    # ---- pass 2: attention + residual + LayerNorm1 ----
    src1 = pl.pallas_call(
        functools.partial(attn_kernel, n_heads=n_heads, head_dim=head_dim,
                          exp_dtype=exp_dtype),
        out_shape=jax.ShapeDtypeStruct((B, S, H), jnp.float32),
        grid_spec=pltpu.PrefetchScalarGridSpec(
            num_scalar_prefetch=0,
            grid=(B, n_q),
            in_specs=[
                row2,                                             # src (f32 residual)
                row2,                                             # q (bf16, scaled)
                pl.BlockSpec((1, S, H), lambda b, i: (b, 0, 0)),  # k (bf16, full seq)
                pl.BlockSpec((1, S, H), lambda b, i: (b, 0, 0)),  # v (bf16, full seq)
                pl.BlockSpec((1, 1, S), lambda b, i: (b, 0, 0)),  # mask bias
                full2((H, H)), full2((1, H)),                     # wo, bo
                full2((1, H)), full2((1, H)),                     # ln1 gamma, beta
            ],
            out_specs=row2,
        ),
        compiler_params=cparams2,
    )(src, q, k, v, bias, bf16(params["wo"]), params["bo"],
      params["ln1_g"], params["ln1_b"])

    # ---- pass 3: FFN with streamed weight tiles + residual + LayerNorm2 ----
    full3 = lambda shape: pl.BlockSpec(shape, lambda b, i, p: (0,) * len(shape))
    row3 = pl.BlockSpec((1, tq, H), lambda b, i, p: (b, i, 0))
    out = pl.pallas_call(
        ffn_kernel,
        out_shape=jax.ShapeDtypeStruct((B, S, H), jnp.float32),
        grid_spec=pltpu.PrefetchScalarGridSpec(
            num_scalar_prefetch=0,
            grid=(B, n_q, n_p),
            in_specs=[
                row3,                                             # src1 (f32)
                pl.BlockSpec((H, pb), lambda b, i, p: (0, p)),    # w1 tile (bf16)
                pl.BlockSpec((1, pb), lambda b, i, p: (0, p)),    # b1 tile
                pl.BlockSpec((pb, H), lambda b, i, p: (p, 0)),    # w2 tile (bf16)
                full3((1, H)),                                    # b2
                full3((1, H)), full3((1, H)),                     # ln2 gamma, beta
            ],
            out_specs=row3,
            scratch_shapes=[pltpu.VMEM((tq, H), jnp.float32)],
        ),
        compiler_params=pltpu.CompilerParams(
            dimension_semantics=("parallel", "parallel", "arbitrary"),
            vmem_limit_bytes=vmem_limit),
    )(src1, bf16(params["w1"]), params["b1"], bf16(params["w2"]), params["b2"],
      params["ln2_g"], params["ln2_b"])

    return out


def reference(src, src_mask, p, n_heads):
    # pure-JAX f32 reference mirroring the PyTorch forward (dropout = identity)
    B, S, H = src.shape
    hd = H // n_heads
    ln = lambda x, g, b: (
        (x - x.mean(-1, keepdims=True))
        / jnp.sqrt(((x - x.mean(-1, keepdims=True)) ** 2).mean(-1, keepdims=True) + 1e-5)
        * g + b
    )
    q = (src @ p["wq"] + p["bq"][0]).reshape(B, S, n_heads, hd).transpose(0, 2, 1, 3)
    k = (src @ p["wk"] + p["bk"][0]).reshape(B, S, n_heads, hd).transpose(0, 2, 1, 3)
    v = (src @ p["wv"] + p["bv"][0]).reshape(B, S, n_heads, hd).transpose(0, 2, 1, 3)
    energy = jnp.einsum("bhqd,bhkd->bhqk", q, k) / jnp.sqrt(jnp.float32(hd))
    energy = jnp.where(src_mask.reshape(B, 1, 1, S) == 0, -1e10, energy)
    attn = jax.nn.softmax(energy, axis=-1)
    x = jnp.einsum("bhqk,bhkd->bhqd", attn, v).transpose(0, 2, 1, 3).reshape(B, S, H)
    x = x @ p["wo"] + p["bo"][0]
    src1 = ln(src + x, p["ln1_g"], p["ln1_b"])
    ff = jnp.maximum(src1 @ p["w1"] + p["b1"][0], 0.0) @ p["w2"] + p["b2"][0]
    return ln(src1 + ff, p["ln2_g"], p["ln2_b"])


if __name__ == "__main__":
    B, S, H, P, n_heads = 2, 8, 32, 64, 4

    key = jax.random.PRNGKey(0)
    keys = jax.random.split(key, 16)
    sc = 0.05
    params = {
        "wq": jax.random.normal(keys[0], (H, H), jnp.float32) * sc,
        "bq": jax.random.normal(keys[1], (1, H), jnp.float32) * sc,
        "wk": jax.random.normal(keys[2], (H, H), jnp.float32) * sc,
        "bk": jax.random.normal(keys[3], (1, H), jnp.float32) * sc,
        "wv": jax.random.normal(keys[4], (H, H), jnp.float32) * sc,
        "bv": jax.random.normal(keys[5], (1, H), jnp.float32) * sc,
        "wo": jax.random.normal(keys[6], (H, H), jnp.float32) * sc,
        "bo": jax.random.normal(keys[7], (1, H), jnp.float32) * sc,
        "ln1_g": jnp.ones((1, H), jnp.float32),
        "ln1_b": jnp.zeros((1, H), jnp.float32),
        "w1": jax.random.normal(keys[8], (H, P), jnp.float32) * sc,
        "b1": jax.random.normal(keys[9], (1, P), jnp.float32) * sc,
        "w2": jax.random.normal(keys[10], (P, H), jnp.float32) * sc,
        "b2": jax.random.normal(keys[11], (1, H), jnp.float32) * sc,
        "ln2_g": jnp.ones((1, H), jnp.float32),
        "ln2_b": jnp.zeros((1, H), jnp.float32),
    }

    src = jax.random.normal(keys[12], (B, S, H), jnp.float32)
    # mask shape [B, 1, 1, S]: batch 1 has its last two positions masked out
    src_mask = jnp.ones((B, 1, 1, S), jnp.float32).at[1, :, :, -2:].set(0.0)

    out = encoder_layer(src, src_mask, params, n_heads)
    out = jax.block_until_ready(out)

    ref = reference(src, src_mask, params, n_heads)
    assert out.shape == (B, S, H)
    # bf16 GEMMs (+ bf16 exp on v6e/v7x) + approx reciprocal -> loosened tolerance.
    assert jnp.allclose(out, ref, atol=2e-2, rtol=2e-2), "mismatch vs reference"

    print("KERNEL_OK")
</pallas_src>

<mosaic_0001>
module attributes {stable_mosaic.version = 11 : i64} {
  func.func @qkv_proj_kernel(%arg0: i32, %arg1: i32, %arg2: memref<1x8x32xf32, #tpu.memory_space<vmem>>, %arg3: memref<32x32xbf16, #tpu.memory_space<vmem>>, %arg4: memref<1x32xf32, #tpu.memory_space<vmem>>, %arg5: memref<32x32xbf16, #tpu.memory_space<vmem>>, %arg6: memref<1x32xf32, #tpu.memory_space<vmem>>, %arg7: memref<32x32xbf16, #tpu.memory_space<vmem>>, %arg8: memref<1x32xf32, #tpu.memory_space<vmem>>, %arg9: memref<1x8x32xbf16, #tpu.memory_space<vmem>>, %arg10: memref<1x8x32xbf16, #tpu.memory_space<vmem>>, %arg11: memref<1x8x32xbf16, #tpu.memory_space<vmem>>) attributes {dimension_semantics = [#tpu.dimension_semantics<parallel>, #tpu.dimension_semantics<parallel>], iteration_bounds = array<i64: 2, 1>, scalar_prefetch = 0 : i64, scratch_operands = 0 : i64, tpu.core_type = #tpu.core_type<tc>, window_params = [{transform_indices = @transform_0, window_bounds = array<i64: 1, 8, 32>}, {pipeline_mode = #tpu.pipeline_mode<synchronous>, transform_indices = @transform_1, window_bounds = array<i64: 32, 32>}, {pipeline_mode = #tpu.pipeline_mode<synchronous>, transform_indices = @transform_2, window_bounds = array<i64: 1, 32>}, {pipeline_mode = #tpu.pipeline_mode<synchronous>, transform_indices = @transform_3, window_bounds = array<i64: 32, 32>}, {pipeline_mode = #tpu.pipeline_mode<synchronous>, transform_indices = @transform_4, window_bounds = array<i64: 1, 32>}, {pipeline_mode = #tpu.pipeline_mode<synchronous>, transform_indices = @transform_5, window_bounds = array<i64: 32, 32>}, {pipeline_mode = #tpu.pipeline_mode<synchronous>, transform_indices = @transform_6, window_bounds = array<i64: 1, 32>}, {transform_indices = @transform_7, window_bounds = array<i64: 1, 8, 32>}, {transform_indices = @transform_8, window_bounds = array<i64: 1, 8, 32>}, {transform_indices = @transform_9, window_bounds = array<i64: 1, 8, 32>}]} {
    %c0 = arith.constant 0 : index
    %c0_0 = arith.constant 0 : index
    %c0_1 = arith.constant 0 : index
    %0 = vector.load %arg2[%c0, %c0_0, %c0_1] : memref<1x8x32xf32, #tpu.memory_space<vmem>>, vector<1x8x32xf32>
    %1 = vector.shape_cast %0 : vector<1x8x32xf32> to vector<8x32xf32>
    %2 = arith.truncf %1 : vector<8x32xf32> to vector<8x32xbf16>
    %c0_2 = arith.constant 0 : index
    %c0_3 = arith.constant 0 : index
    %3 = vector.load %arg3[%c0_2, %c0_3] : memref<32x32xbf16, #tpu.memory_space<vmem>>, vector<32x32xbf16>
    %cst = arith.constant dense<0.000000e+00> : vector<8x32xf32>
    %4 = tpu.matmul %2, %3, %cst {dimension_numbers = #tpu.dot_dimension_numbers<[1], [0], [0], [1], [0, 0, 1, 1], [], []>} : vector<8x32xbf16>, vector<32x32xbf16>, vector<8x32xf32> -> vector<8x32xf32>
    %c0_4 = arith.constant 0 : index
    %c0_5 = arith.constant 0 : index
    %5 = vector.load %arg4[%c0_4, %c0_5] : memref<1x32xf32, #tpu.memory_space<vmem>>, vector<1x32xf32>
    %6 = vector.broadcast %5 : vector<1x32xf32> to vector<8x32xf32>
    %7 = arith.addf %4, %6 : vector<8x32xf32>
    %c0_6 = arith.constant 0 : index
    %c0_7 = arith.constant 0 : index
    %8 = vector.load %arg5[%c0_6, %c0_7] : memref<32x32xbf16, #tpu.memory_space<vmem>>, vector<32x32xbf16>
    %cst_8 = arith.constant dense<0.000000e+00> : vector<8x32xf32>
    %9 = tpu.matmul %2, %8, %cst_8 {dimension_numbers = #tpu.dot_dimension_numbers<[1], [0], [0], [1], [0, 0, 1, 1], [], []>} : vector<8x32xbf16>, vector<32x32xbf16>, vector<8x32xf32> -> vector<8x32xf32>
    %c0_9 = arith.constant 0 : index
    %c0_10 = arith.constant 0 : index
    %10 = vector.load %arg6[%c0_9, %c0_10] : memref<1x32xf32, #tpu.memory_space<vmem>>, vector<1x32xf32>
    %11 = vector.broadcast %10 : vector<1x32xf32> to vector<8x32xf32>
    %12 = arith.addf %9, %11 : vector<8x32xf32>
    %c0_11 = arith.constant 0 : index
    %c0_12 = arith.constant 0 : index
    %13 = vector.load %arg7[%c0_11, %c0_12] : memref<32x32xbf16, #tpu.memory_space<vmem>>, vector<32x32xbf16>
    %cst_13 = arith.constant dense<0.000000e+00> : vector<8x32xf32>
    %14 = tpu.matmul %2, %13, %cst_13 {dimension_numbers = #tpu.dot_dimension_numbers<[1], [0], [0], [1], [0, 0, 1, 1], [], []>} : vector<8x32xbf16>, vector<32x32xbf16>, vector<8x32xf32> -> vector<8x32xf32>
    %c0_14 = arith.constant 0 : index
    %c0_15 = arith.constant 0 : index
    %15 = vector.load %arg8[%c0_14, %c0_15] : memref<1x32xf32, #tpu.memory_space<vmem>>, vector<1x32xf32>
    %16 = vector.broadcast %15 : vector<1x32xf32> to vector<8x32xf32>
    %17 = arith.addf %14, %16 : vector<8x32xf32>
    %cst_16 = arith.constant 0.353553385 : f32
    %18 = vector.broadcast %cst_16 : f32 to vector<8x32xf32>
    %19 = arith.mulf %7, %18 : vector<8x32xf32>
    %20 = arith.truncf %19 : vector<8x32xf32> to vector<8x32xbf16>
    %c0_17 = arith.constant 0 : index
    %c0_18 = arith.constant 0 : index
    %c0_19 = arith.constant 0 : index
    %21 = vector.load %arg9[%c0_17, %c0_18, %c0_19] : memref<1x8x32xbf16, #tpu.memory_space<vmem>>, vector<1x8x32xbf16>
    %22 = vector.shape_cast %21 : vector<1x8x32xbf16> to vector<8x32xbf16>
    %23 = vector.shape_cast %20 : vector<8x32xbf16> to vector<1x8x32xbf16>
    tpu.vector_store %arg9[%c0_17, %c0_18, %c0_19], %23 {strides = array<i32>} : memref<1x8x32xbf16, #tpu.memory_space<vmem>>, vector<1x8x32xbf16>,
    %24 = arith.truncf %12 : vector<8x32xf32> to vector<8x32xbf16>
    %c0_20 = arith.constant 0 : index
    %c0_21 = arith.constant 0 : index
    %c0_22 = arith.constant 0 : index
    %25 = vector.load %arg10[%c0_20, %c0_21, %c0_22] : memref<1x8x32xbf16, #tpu.memory_space<vmem>>, vector<1x8x32xbf16>
    %26 = vector.shape_cast %25 : vector<1x8x32xbf16> to vector<8x32xbf16>
    %27 = vector.shape_cast %24 : vector<8x32xbf16> to vector<1x8x32xbf16>
    tpu.vector_store %arg10[%c0_20, %c0_21, %c0_22], %27 {strides = array<i32>} : memref<1x8x32xbf16, #tpu.memory_space<vmem>>, vector<1x8x32xbf16>,
    %28 = arith.truncf %17 : vector<8x32xf32> to vector<8x32xbf16>
    %c0_23 = arith.constant 0 : index
    %c0_24 = arith.constant 0 : index
    %c0_25 = arith.constant 0 : index
    %29 = vector.load %arg11[%c0_23, %c0_24, %c0_25] : memref<1x8x32xbf16, #tpu.memory_space<vmem>>, vector<1x8x32xbf16>
    %30 = vector.shape_cast %29 : vector<1x8x32xbf16> to vector<8x32xbf16>
    %31 = vector.shape_cast %28 : vector<8x32xbf16> to vector<1x8x32xbf16>
    tpu.vector_store %arg11[%c0_23, %c0_24, %c0_25], %31 {strides = array<i32>} : memref<1x8x32xbf16, #tpu.memory_space<vmem>>, vector<1x8x32xbf16>,
    return
  }
  func.func @transform_0(%arg0: i32, %arg1: i32) -> (i32, i32, i32) {
    %c0_i32 = arith.constant 0 : i32
    %c0_i32_0 = arith.constant 0 : i32
    return %arg0, %arg1, %c0_i32 : i32, i32, i32
  }
  func.func @transform_1(%arg0: i32, %arg1: i32) -> (i32, i32) {
    %c0_i32 = arith.constant 0 : i32
    %c0_i32_0 = arith.constant 0 : i32
    %c0_i32_1 = arith.constant 0 : i32
    return %c0_i32, %c0_i32_0 : i32, i32
  }
  func.func @transform_2(%arg0: i32, %arg1: i32) -> (i32, i32) {
    %c0_i32 = arith.constant 0 : i32
    %c0_i32_0 = arith.constant 0 : i32
    %c0_i32_1 = arith.constant 0 : i32
    return %c0_i32, %c0_i32_0 : i32, i32
  }
  func.func @transform_3(%arg0: i32, %arg1: i32) -> (i32, i32) {
    %c0_i32 = arith.constant 0 : i32
    %c0_i32_0 = arith.constant 0 : i32
    %c0_i32_1 = arith.constant 0 : i32
    return %c0_i32, %c0_i32_0 : i32, i32
  }
  func.func @transform_4(%arg0: i32, %arg1: i32) -> (i32, i32) {
    %c0_i32 = arith.constant 0 : i32
    %c0_i32_0 = arith.constant 0 : i32
    %c0_i32_1 = arith.constant 0 : i32
    return %c0_i32, %c0_i32_0 : i32, i32
  }
  func.func @transform_5(%arg0: i32, %arg1: i32) -> (i32, i32) {
    %c0_i32 = arith.constant 0 : i32
    %c0_i32_0 = arith.constant 0 : i32
    %c0_i32_1 = arith.constant 0 : i32
    return %c0_i32, %c0_i32_0 : i32, i32
  }
  func.func @transform_6(%arg0: i32, %arg1: i32) -> (i32, i32) {
    %c0_i32 = arith.constant 0 : i32
    %c0_i32_0 = arith.constant 0 : i32
    %c0_i32_1 = arith.constant 0 : i32
    return %c0_i32, %c0_i32_0 : i32, i32
  }
  func.func @transform_7(%arg0: i32, %arg1: i32) -> (i32, i32, i32) {
    %c0_i32 = arith.constant 0 : i32
    %c0_i32_0 = arith.constant 0 : i32
    return %arg0, %arg1, %c0_i32 : i32, i32, i32
  }
  func.func @transform_8(%arg0: i32, %arg1: i32) -> (i32, i32, i32) {
    %c0_i32 = arith.constant 0 : i32
    %c0_i32_0 = arith.constant 0 : i32
    return %arg0, %arg1, %c0_i32 : i32, i32, i32
  }
  func.func @transform_9(%arg0: i32, %arg1: i32) -> (i32, i32, i32) {
    %c0_i32 = arith.constant 0 : i32
    %c0_i32_0 = arith.constant 0 : i32
    return %arg0, %arg1, %c0_i32 : i32, i32, i32
  }
}

</mosaic_0001>

<bundles_post_ra>
// kernel: tpu_custom_call.1
= control target key start
LH: loop header
LB: loop body
LE: loop exit
PB: predicated region body
PF: predicated region fallthrough
CT: control target
= control target key end

     0   :  { %s1522_s0 = inlined_call_operand.hbm [shape: f32[2,8,32], index: 0, kind: input, shape index: {}]   ;;  %s1523_s1 = inlined_call_operand.hbm [shape: bf16[32,32], index: 1, kind: input, shape index: {}]   ;;  %s1524_s2 = inlined_call_operand.vmem [shape: f32[1,32], index: 2, kind: input, shape index: {}]   ;;  %s1525_s3 = inlined_call_operand.hbm [shape: bf16[32,32], index: 3, kind: input, shape index: {}]   ;;  %s1526_s4 = inlined_call_operand.vmem [shape: f32[1,32], index: 4, kind: input, shape index: {}]   ;;  %s1527_s5 = inlined_call_operand.hbm [shape: bf16[32,32], index: 5, kind: input, shape index: {}]   ;;  %s1528_s6 = inlined_call_operand.vmem [shape: f32[1,32], index: 6, kind: input, shape index: {}]   ;;  %s1529_s7 = inlined_call_operand.hbm [shape: bf16[2,8,32], index: 7, kind: output, shape index: {0}]   ;;  %s1530_s8 = inlined_call_operand.hbm [shape: bf16[2,8,32], index: 8, kind: output, shape index: {1}]   ;;  %s1531_s9 = inlined_call_operand.hbm [shape: bf16[2,8,32], index: 9, kind: output, shape index: {2}]  }
   0x1   :  { %1534 = sst [smem:[#allocation20_spill]] %s1522_s0 }
   0x2   :  { %1535 = sst [smem:[#allocation21_spill]] %s1523_s1 }
   0x3   :  { %1536 = sst [smem:[#allocation22_spill]] %s1524_s2 }
   0x4   :  { %1537 = sst [smem:[#allocation23_spill]] %s1525_s3 }
   0x5   :  { %1538 = sst [smem:[#allocation24_spill]] %s1526_s4 }
   0x6   :  { %1539 = sst [smem:[#allocation25_spill]] %s1527_s5 }
   0x7   :  { %15 = vsyncpa [#allocation3], 0 }
   0x8   :  { %17 = vsyncpa [#allocation3 + $0x1], 0 }
   0x9   :  { %18 = vsyncpa [#allocation6], 0 }
   0xa   :  { %19 = vsyncpa [#allocation9], 0 }
   0xb   :  { %20 = vsyncpa [#allocation4], 0 }
   0xc   :  { %22 = vsyncpa [#allocation4 + $0x1], 0 }
   0xd   :  { %23 = vsyncpa [#allocation12], 0 }
   0xe   :  { %25 = vsyncpa [#allocation12 + $0x1], 0  ;;  %s1277_s30 = smov 0   ;;  %s1279_s10 = smov 0  }
   0xf   :  { %s1281_s11 = smov 0   ;;  %s1283_s12 = smov 0  }
  0x10   :  { %s1285_s13 = smov 0   ;;  %s1287_s14 = smov 0  }
  0x11 LB: > { %s1308_s15 = sadd.s32 4294967295, %s1220_s14   ;;  %p786_p0 = scmp.ge.s32.totalorder %s1220_s14, 1  ;;  %s1220_s14 = sphi %s1287_s14, %s31_s14   ;;  %s1216_s13 = sphi %s1285_s13, %s1559_s13   ;;  %s1212_s12 = sphi %s1283_s12, %s1558_s12   ;;  %s1208_s11 = sphi %s1281_s11, %s1557_s11   ;;  %s1204_s10 = sphi %s1279_s10, %s1556_s10   ;;  %s1200_s30 = sphi %s1277_s30, %s1555_s30  }
  0x12   : > { %p66_p1 = scmp.eq.s32.totalorder %s1308_s15, 0  ;;  %p286_p2 = scmp.lt.s32.totalorder %s1220_s14, 3 }
  0x13   : > { %s1540_s1 = sld [smem:[#allocation21_spill]]  ;;  %s1222_s20 = smov [#allocation5]  }
  0x14   : > { %p1316_p3 = pnand %p786_p0, %p286_p2  ;;  %s299_s21 = sshll.u32 %s1222_s20, 4  ;;  %s300_s21 = int_to_ptr.vmem [resolvable:$true] %s299_s21 }
  0x15   : > { %p790_p6 = scmp.ge.s32.totalorder %s1220_s14, 2  ;;  %s1543_s3 = sld [smem:[#allocation23_spill]] }
  0x16   : > { %p862_p4 = pneg %p1316_p3  ;;  %s1223_s26 = smov 64  }
  0x17   : > { %s1224_s27 = smov 4   ;;  %s1225_s28 = smov [#allocation7]  }
  0x18   : > { %p1324_p5 = pnand %p862_p4, %p66_p1  ;;  %s316_s29 = sshll.u32 %s1225_s28, 4  ;;  %s317_s29 = int_to_ptr.vmem [resolvable:$true] %s316_s29 }
  0x19   : > { %s297_s18 = sshll.u32 %s1540_s1, 4  ;;  %s1544_s5 = sld [smem:[#allocation25_spill]]  ;;  %s298_s18 = int_to_ptr.hbm [resolvable:$true] %s297_s18 }
  0x1a   : > { %865 = dma.hbm_to_vmem [thread:$0]  (!%p1324_p5), %s298_s18, 256, %s300_s21, [#allocation6], %s1223_s26, %s1223_s26, %s1224_s27  }
  0x1b   : > { %s314_s25 = sshll.u32 %s1543_s3, 4  ;;  %s1226_s23 = smov [#allocation8]   ;;  %s315_s25 = int_to_ptr.hbm [resolvable:$true] %s314_s25 }
  0x1c   : > { %868 = dma.hbm_to_vmem [thread:$0]  (!%p1324_p5), %s315_s25, 256, %s317_s29, [#allocation6], %s1223_s26, %s1223_s26, %s1224_s27  }
  0x1d   : > { %s333_s24 = sshll.u32 %s1226_s23, 4  ;;  %s1532_s18 = sadd.s32 4294967294, %s1220_s14   ;;  %s334_s24 = int_to_ptr.vmem [resolvable:$true] %s333_s24 }
  0x1e   : > { %s43_s21 = sadd.s32 1, %s1216_s13  ;;  %s52_s28 = sadd.s32 1, %s1208_s11 }
  0x1f   : > { %s331_s20 = sshll.u32 %s1544_s5, 4  ;;  %p45_p7 = scmp.ge.s32.totalorder %s43_s21, 2  ;;  %s332_s20 = int_to_ptr.hbm [resolvable:$true] %s331_s20 }
  0x20   : > { %871 = dma.hbm_to_vmem [thread:$0]  (!%p1324_p5), %s332_s20, 256, %s334_s24, [#allocation9], %s1223_s26, %s1223_s26, %s1224_s27  }
  0x21   : > { %p59_p8 = scmp.ne.s32.totalorder %s1208_s11, %s1204_s10  ;;  %p60_p9 = scmp.eq.s32.totalorder %s1220_s14, 0 }
  0x22   : > { %p65_p10 = scmp.ne.s32.totalorder %s1204_s10, %s1200_s30  ;;  %s1561_s21 = smov (%p45_p7, %s43_s21), 0 }
  0x23   : > { %1545 = sst [smem:[#allocation19_spill]] %s1561_s21  ;;  %p1351_p11 = por %p60_p9, %p59_p8 }
  0x24   : > { %p1357_p12 = por %p66_p1, %p65_p10  ;;  %s47_s26 = ssub.s32 %s1216_s13, %s1561_s21 }
  0x25   : > { %p217_p13 = scmp.eq.s32.totalorder %s1308_s15, 1  ;;  %p50_p0 = scmp.eq.s32.totalorder %s47_s26, 0 }
  0x26   : > { %p223_p2 = scmp.eq.s32.totalorder %s1532_s18, 1  ;;  %p889_p5 = scmp.lt.s32.totalorder %s1220_s14, 2 }
  0x27   : > { %p1366_p4 = por %p217_p13, %p59_p8  ;;  %s350_s17 = sand.u32 1, %s1208_s11  }
  0x28   : > { %s1372_s29 = scalar_select %p50_p0, %s1208_s11, %s52_s28  }
  0x29   : > { %p1374_p7 = por %p223_p2, %p65_p10  ;;  %s791_s20 = sshll.u32 %s350_s17, 3 }
  0x2a   : > { %s792_s23 = sshll.u32 %s1216_s13, 3  ;;  %s1550_s0 = sld [smem:[#allocation20_spill]] }
  0x2b   : > { %s354_s3 = scalar_lea.vmem [#allocation2], %s791_s20  ;;  %p873_p8 = pnand %p889_p5, %p1351_p11 }
  0x2c   : > { %s363_s18 = sshll.u32 %s354_s3, 4  ;;  %s351_s28 = scalar_lea.sflag [#allocation3], %s350_s17  ;;  %s364_s18 = int_to_ptr.vmem [resolvable:$true] %s363_s18 }
  0x2d   : > { %s1388_s21 = sand.u32 (!%p1316_p3), 1, %s1204_s10  }
  0x2e   : > { %372 = sbr.rel (%p1316_p3) target bundleno = 223 (0xdf), region = 48  ;;  %s794_s1 = sshll.u32 (!%p1316_p3), %s1388_s21, 3 }
  0x2f   : > { %s378_s20 = scalar_lea.vmem (!%p1316_p3), [#allocation2], %s794_s1 }
  0x30   : > { %s359_s26 = scalar_lea.hbm %s1550_s0, %s792_s23  ;;  %s375_s23 = scalar_lea.sflag (!%p1316_p3), [#allocation3], %s1388_s21 }
  0x31   : > { %s361_s5 = sshll.u32 %s359_s26, 4  ;;  %s362_s5 = int_to_ptr.hbm [resolvable:$true] %s361_s5 }
  0x32   : > { %875 = dma.hbm_to_vmem [thread:$0]  (!%p873_p8), %s362_s5, 128, %s364_s18, %s351_s28  }
  0x33   : > { %1179 = dma.done.wait (%p1357_p12), %s375_s23, 128  }
  0x34   : > { %1181 = vsyncadd (%p1357_p12), %s375_s23, 4294967168 }
  0x35   : > { %1183 = dma.done.wait (%p66_p1), [#allocation6], 512  }
  0x36   : > { %1185 = vsyncadd (%p66_p1), [#allocation6], 4294966784 }
  0x37   : > { %1187 = dma.done.wait (%p66_p1), [#allocation9], 256  }
  0x38   : > { %1189 = vsyncadd (%p66_p1), [#allocation9], 4294967040  ;;  %v837_v0 = vld [vmem:[#allocation5 + $0x8] sm:$0xff]  ;;  %v839_v1 = vld [vmem:[#allocation7 + $0x8] sm:$0xff]  ;;  %vm462_vm0 = vcmask 261120   ;;  %s1405_s3 = sshll.u32 %s1388_s21, 2 }
  0x39   : > { %v841_v2 = vld [vmem:[#allocation8 + $0x8] sm:$0xff]  ;;  %v836_v3 = vld [vmem:[#allocation5] sm:$0xff]  ;;  %472 = vmatpush.bf16.msra.mxu0 %v837_v0  ;;  %505 = vmatpush.bf16.msra.mxu1 %v839_v1  ;;  %v838_v4 = vld [vmem:[#allocation7] sm:$0xff]  ;;  %s1408_s5 = sshll.u32 %s1212_s12, 2  ;;  %s1551_s2 = sld [smem:[#allocation22_spill]]  ;;  %vm547_vm1 = vcmask 257024  }
  0x3a   : > { %v440_v5 = vld [vmem:[%s378_s20] sm:$0xff]  ;;  %538 = vmatpush.bf16.msra.mxu2 %v841_v2  ;;  %v840_v6 = vld [vmem:[#allocation8] sm:$0xff]  ;;  %s1552_s4 = sld [smem:[#allocation24_spill]]  ;;  %s590_s26 = scalar_lea.hbm %s1530_s8, %s1408_s5 }
  0x3b   : > { %v441_v7 = vpack.c.bf16 %v440_v5, %v440_v5  ;;  %s558_s28 = sand.u32 1, %s1308_s15   ;;  %s431_s1 = scalar_lea.vmem [#allocation11], %s1405_s3  ;;  %v949_v16 = vld [vmem:[%s1528_s6] ss:$0 sm:$0xff] }
  0x3c   : > { %s1422_s23 = sshll.u32 %s431_s1, 4  ;;  %s575_s19 = scalar_lea.hbm %s1529_s7, %s1408_s5  ;;  %s593_s23 = int_to_ptr.vmem [resolvable:$true] %s1422_s23 }
  0x3d   : > { %473 = vmatpush.bf16.msra.mxu0 %v836_v3  ;;  %506 = vmatpush.bf16.msra.mxu1 %v838_v4  ;;  %s1428_s18 = sshll.u32 %s590_s26, 4  ;;  %s424_s25 = scalar_lea.vmem [#allocation10], %s1405_s3  ;;  %s595_s18 = int_to_ptr.hbm [resolvable:$true] %s1428_s18 }
  0x3e   : > { %539 = vmatpush.bf16.msra.mxu2 %v840_v6  ;;  %s1432_s15 = sshll.u32 %s424_s25, 4  ;;  %s1434_s22 = sshll.u32 %s575_s19, 4  ;;  %s578_s15 = int_to_ptr.vmem [resolvable:$true] %s1432_s15  ;;  %s580_s22 = int_to_ptr.hbm [resolvable:$true] %s1434_s22 }
  0x3f   : > { %v947_v8 = vld [vmem:[%s1551_s2] ss:$0 sm:$0xff]  ;;  %s605_s20 = scalar_lea.hbm %s1531_s9, %s1408_s5  ;;  %s1447_s0 = scalar_lea.sflag [#allocation12], %s558_s28 }
  0x40   : > { %809 = vmatmul.msk.bf16.vlgmr.msra.gmra.mxu0 %vm462_vm0, %v441_v7  ;;  %818 = vmatmul.msk.bf16.vlgmr.msra.gmra.mxu1 %vm462_vm0, %v441_v7  ;;  %v948_v9 = vld [vmem:[%s1552_s4] ss:$0 sm:$0xff]  ;;  %s1084_s19 = sshra.s32 %s595_s18, 4  ;;  %s1090_s4 = scalar_lea.hbm %s1530_s8, 8  ;;  %s1085_s19 = int_to_ptr.hbm [resolvable:$true] %s1084_s19 }
  0x41   : > { %827 = vmatmul.msk.bf16.vlgmr.msra.gmra.mxu2 %vm462_vm0, %v441_v7  ;;  %s1086_s2 = scalar_lea.hbm %s1085_s19, 4  ;;  %p1091_p10 = scmp.lt.s32.totalorder %s1085_s19, %s1530_s8 }
  0x42   : > { %p1087_p1 = scmp.ne.s32.totalorder %s1085_s19, %s1086_s2  ;;  %p1092_p11 = scmp.lt.s32.totalorder %s1090_s4, %s1086_s2 }
  0x44   : > { %p1088_p3 = pnand %p1087_p1, %p1366_p4  ;;  %p1093_p12 = por %p1092_p11, %p1091_p10 }
  0x46   : > { %p1089_p9 = pneg %p1088_p3 }
  0x48   : > { %p1094_p13 = pnand %p1093_p12, %p1089_p9 }
  0xbd   : > { %v475_v10 = vpop.f32.mrf.mxu0  ;;  %v508_v11 = vpop.f32.mrf.mxu1 }
  0xbe   : > { %v476_v12 = vadd.f32 %v947_v8, %v475_v10  ;;  %v509_v13 = vadd.f32 %v948_v9, %v508_v11 }
  0xc0   : > { %v545_v14 = vmul.f32 0.35355338, %v476_v12  ;;  %v549_v15 = vpack.c.bf16 %v509_v13, %v509_v13 }
  0xc2   : > { %v546_v17 = vpack.c.bf16 %v545_v14, %v545_v14  ;;  %550 = vst.msk [vmem:[%s431_s1] sm:$0xf] %vm547_vm1, %v549_v15 }
  0xc3   : > { %1097 = shalt.err (!%p1094_p13)
}
  0xc4   : > { %857 = dma.vmem_to_hbm [thread:$0]  (%p1366_p4), %s593_s23, 64, %s595_s18, %s1447_s0   ;;  %v541_v18 = vpop.f32.mrf.mxu2  ;;  %548 = vst.msk [vmem:[%s424_s25] sm:$0xf] %vm547_vm1, %v546_v17 }
  0xc5   : > { %s438_s28 = scalar_lea.vmem [#allocation13], %s1405_s3  ;;  %s1464_s12 = sshll.u32 %s605_s20, 4  ;;  %v542_v19 = vadd.f32 %v949_v16, %v541_v18  ;;  %v477_v20 = vpop.f32.mrf.mxu0  ;;  %v510_v21 = vpop.f32.mrf.mxu1  ;;  %s610_s12 = int_to_ptr.hbm [resolvable:$true] %s1464_s12 }
  0xc6   : > { %s1462_s1 = sshll.u32 %s438_s28, 4  ;;  %s554_s2 = scalar_lea.sflag [#allocation4], %s1388_s21  ;;  %s608_s1 = int_to_ptr.vmem [resolvable:$true] %s1462_s1 }
  0xc7   : > { %s1112_s4 = sshra.s32 %s580_s22, 4  ;;  %s1118_s3 = scalar_lea.hbm %s1529_s7, 8  ;;  %s1113_s4 = int_to_ptr.hbm [resolvable:$true] %s1112_s4 }
  0xc8   : > { %s1114_s19 = scalar_lea.hbm %s1113_s4, 4  ;;  %p1119_p8 = scmp.lt.s32.totalorder %s1113_s4, %s1529_s7 }
  0xc9   : > { %p1115_p0 = scmp.ne.s32.totalorder %s1113_s4, %s1114_s19  ;;  %p1120_p1 = scmp.lt.s32.totalorder %s1118_s3, %s1114_s19 }
  0xcb   : > { %p1116_p2 = pnand %p1115_p0, %p1366_p4  ;;  %p1121_p3 = por %p1120_p1, %p1119_p8 }
  0xcd   : > { %p1117_p5 = pneg %p1116_p2 }
  0xcf   : > { %p1122_p9 = pnand %p1121_p3, %p1117_p5 }
  0xd1   : > { %1125 = shalt.err (!%p1122_p9)
}
  0xd2   : > { %856 = dma.vmem_to_hbm [thread:$0]  (%p1366_p4), %s578_s15, 64, %s580_s22, %s554_s2   ;;  %v551_v22 = vpack.c.bf16 %v542_v19, %v542_v19 }
  0xd3   : > { %s1140_s21 = sshra.s32 %s610_s12, 4  ;;  %s1146_s5 = scalar_lea.hbm %s1531_s9, 8  ;;  %s1141_s21 = int_to_ptr.hbm [resolvable:$true] %s1140_s21 }
  0xd4   : > { %552 = vst.msk [vmem:[%s438_s28] sm:$0xf] %vm547_vm1, %v551_v22  ;;  %s1142_s20 = scalar_lea.hbm %s1141_s21, 4  ;;  %p1147_p13 = scmp.lt.s32.totalorder %s1141_s21, %s1531_s9 }
  0xd5   : > { %p1143_p10 = scmp.ne.s32.totalorder %s1141_s21, %s1142_s20  ;;  %p1148_p0 = scmp.lt.s32.totalorder %s1146_s5, %s1142_s20 }
  0xd7   : > { %p1144_p11 = pnand %p1143_p10, %p1366_p4  ;;  %p1149_p2 = por %p1148_p0, %p1147_p13 }
  0xd9   : > { %p1145_p12 = pneg %p1144_p11 }
  0xdb   : > { %p1150_p5 = pnand %p1149_p2, %p1145_p12 }
  0xdd   : > { %1153 = shalt.err (!%p1150_p5)
}
  0xde   : > { %858 = dma.vmem_to_hbm [thread:$0]  (%p1366_p4), %s608_s1, 64, %s610_s12, %s1447_s0   ;;  %v543_v23 = vpop.f32.mrf.mxu2 }
  0xdf PF: > { %s621_s15 = sand.u32 1, %s1200_s30   ;;  %p877_p8 = pnand %p790_p6, %p1374_p7 }
  0xe0   : > { %s622_s22 = scalar_lea.sflag [#allocation4], %s621_s15 }
  0xe1   : > { %p878_p1 = pneg %p877_p8 }
  0xe3   : > { %1191 = dma.done.wait (%p878_p1), %s622_s22, 64  }
  0xe4   : > { %1193 = vsyncadd (%p878_p1), %s622_s22, 4294967232  ;;  %s1553_s28 = sadd.s32 4294967294, %s1220_s14  }
  0xe5   : > { %s631_s2 = sand.u32 1, %s1553_s28  }
  0xe6   : > { %s632_s23 = scalar_lea.sflag [#allocation12], %s631_s2 }
  0xe7   : > { %1195 = dma.done.wait (%p878_p1), %s632_s23, 128  }
  0xe8   : > { %1197 = vsyncadd (%p878_p1), %s632_s23, 4294967168  ;;  %s31_s14 = sadd.s32 1, %s1220_s14   ;;  %s1554_s0 = sld [smem:[#allocation19_spill]] }
  0xe9   : > { %p28_p4 = scmp.ge.s32.totalorder %s31_s14, 4   ;;  %s1555_s30 = smov %s1204_s10 }
  0xea   : > { %s1556_s10 = smov %s1208_s11  ;;  %s1557_s11 = smov %s1372_s29 }
  0xeb   : > { %s1558_s12 = smov %s1216_s13  ;;  %30 = sbr.rel (!%p28_p4) target bundleno = 17 (0x11), region = 137 }
  0xee   : > { %s1559_s13 = smov %s1554_s0 }
  0xf0   :  { %648 = vsyncpa [#allocation3], 1 }
  0xf1   :  { %650 = vsyncpa [#allocation3 + $0x1], 1 }
  0xf2   :  { %651 = vsyncpa [#allocation6], 1 }
  0xf3   :  { %652 = vsyncpa [#allocation9], 1 }
  0xf4   :  { %653 = vsyncpa [#allocation4], 1 }
  0xf5   :  { %655 = vsyncpa [#allocation4 + $0x1], 1 }
  0xf6   :  { %656 = vsyncpa [#allocation12], 1 }
  0xf7   :  { %658 = vsyncpa [#allocation12 + $0x1], 1 }

</bundles_post_ra>
